<compile_context>
chip_gen: v5e
topology: v5e:2x2
jax: 0.10.0
libtpu: 0.0.40
codegen_flags: <defaults>
</compile_context>

<pallas_src>
import functools

import jax
import jax.numpy as jnp
from jax.experimental import pallas as pl
from jax.experimental.pallas import tpu as pltpu


# ----------------------------------------------------------------------------
# helpers
# ----------------------------------------------------------------------------
def _round_up(x: int, m: int) -> int:
    return ((x + m - 1) // m) * m


def _pick_block(total: int, target: int, align: int = 8) -> int:
    """Largest divisor of `total` that is <= target and a multiple of `align`."""
    if total <= target:
        return total
    for d in range(target, 0, -1):
        if total % d == 0 and d % align == 0:
            return d
    # TODO(synk): use pl.cdiv grid + padded/masked tail instead of a full-dim
    # fallback (a full block can blow VMEM for awkward T*B, esp. on v7x).
    return total


@functools.lru_cache(maxsize=1)
def _vmem_limit_bytes() -> int:
    """~75% of physical VMEM: leaves headroom for compiler scratch/semaphores.
    (v7x: ~48 MiB of 64; v5e/v6e: ~96 MiB of 128.)"""
    try:
        cap = int(getattr(pltpu.get_tpu_info(), "vmem_capacity_bytes"))
        return max(32 * 1024 * 1024, min(cap * 3 // 4, 112 * 1024 * 1024))
    except Exception:
        return 48 * 1024 * 1024


# ----------------------------------------------------------------------------
# Fused input projection: gx = X @ W_ih_fused + (b_ih + b_hh)
# W_ih_fused is (H, 4H) with gate-contiguous columns [i|f|g|o]; x is read once.
# ----------------------------------------------------------------------------
def _input_proj_kernel(x_ref, w_ref, b_ref, gx_ref):
    gx_ref[...] = (jnp.dot(x_ref[...], w_ref[...],
                           preferred_element_type=jnp.float32)
                   + b_ref[...]).astype(gx_ref.dtype)


def input_projection(x_flat, w_ih_fused, bias_fused, *, row_block=1024,
                     out_dtype=jnp.float32):
    """x_flat: (M, H) time-major rows; w_ih_fused: (H, 4H); bias_fused: (1, 4H).
    Returns gx: (M, 4H)."""
    M, H = x_flat.shape
    G = w_ih_fused.shape[1]
    rm = _pick_block(M, row_block, align=8)
    return pl.pallas_call(
        _input_proj_kernel,
        out_shape=jax.ShapeDtypeStruct((M, G), out_dtype),
        grid_spec=pltpu.PrefetchScalarGridSpec(
            num_scalar_prefetch=0,
            grid=(M // rm,),
            in_specs=[
                pl.BlockSpec((rm, H), lambda m: (m, 0)),   # x rows (read once)
                pl.BlockSpec((H, G), lambda m: (0, 0)),    # fused W_ih (constant)
                pl.BlockSpec((1, G), lambda m: (0, 0)),    # fused bias (constant)
            ],
            out_specs=pl.BlockSpec((rm, G), lambda m: (m, 0)),
        ),
        compiler_params=pltpu.CompilerParams(
            dimension_semantics=("parallel",),
            vmem_limit_bytes=_vmem_limit_bytes()),
    )(x_flat, w_ih_fused, bias_fused)


# ----------------------------------------------------------------------------
# Recurrent LSTM kernel: tt timesteps per grid step, one fused (bt,H)@(H,4H)
# recurrent matmul per step, W_hh single-buffered in VMEM scratch.
# ----------------------------------------------------------------------------
def _lstm_recurrent_kernel(gx_ref, h0_ref, c0_ref, whh_hbm,
                           y_ref, cn_ref, h_scr, c_scr, w_scr):
    # gx_ref : (tt, bt, 4H)   h0/c0 : (bt, H)   whh_hbm : (H, 4H) in HBM
    # y_ref  : (tt, bt, H)    cn_ref: (bt, H)
    # scratch: h_scr/c_scr (bt, H) f32, w_scr (H, 4H) single-buffered weight
    t_blk = pl.program_id(1)
    H = h0_ref.shape[-1]

    @pl.when(t_blk == 0)
    def _():
        pltpu.sync_copy(whh_hbm, w_scr)      # DMA the resident weight once
        h_scr[...] = h0_ref[...]
        c_scr[...] = c0_ref[...]

    w = w_scr[...]                           # (H, 4H), hoisted out of the loop
    tt_steps = y_ref.shape[0]

    def sigm(x):
        # one EUP op (tanh) per gate; the VPU mul/add are free filler slots
        return 0.5 * jnp.tanh(0.5 * x) + 0.5

    def step(tt, carry):
        h, c = carry
        # single fused recurrent matmul; gate slices are lane slices
        g = gx_ref[tt].astype(jnp.float32) + jnp.dot(
            h.astype(w.dtype), w, preferred_element_type=jnp.float32)
        i = sigm(g[:, 0 * H:1 * H])
        f = sigm(g[:, 1 * H:2 * H])
        gg = jnp.tanh(g[:, 2 * H:3 * H])
        o = sigm(g[:, 3 * H:4 * H])
        c_new = f * c + i * gg
        h_new = o * jnp.tanh(c_new)
        y_ref[tt] = h_new.astype(y_ref.dtype)
        return (h_new, c_new)

    # moderate unroll (<=8) keeps LLO visibility without vreg-spill pressure
    h_fin, c_fin = jax.lax.fori_loop(0, tt_steps, step,
                                     (h_scr[...], c_scr[...]),
                                     unroll=min(int(tt_steps), 8))
    h_scr[...] = h_fin
    c_scr[...] = c_fin
    cn_ref[...] = c_fin                      # resident block (constant t index)


def lstm_layer(gx, h0, c0, w_hh_fused, *, time_block=32):
    """gx: (T, B, 4H) precomputed x @ W_ih_fused + bias (time-major, fused gates).
    Returns y (T, B, H) and c_n (B, H).  (h_n is y[T-1].)"""
    T, B, G = gx.shape
    H = G // 4
    tt = _pick_block(T, time_block, align=1)
    # Never split the batch below B: per step the MXU streams the full (H,4H)
    # weight regardless of bt, so smaller bt only de-amortizes that stream.
    # (On v7x split into 2 blocks only when B >= 256 so each core keeps >=128.)
    bt = B
    grid = (B // bt, T // tt)
    return pl.pallas_call(
        _lstm_recurrent_kernel,
        out_shape=(
            jax.ShapeDtypeStruct((T, B, H), gx.dtype),    # y (time-major)
            jax.ShapeDtypeStruct((B, H), jnp.float32),    # c_n
        ),
        grid_spec=pltpu.PrefetchScalarGridSpec(
            num_scalar_prefetch=0,
            grid=grid,
            in_specs=[
                pl.BlockSpec((tt, bt, G), lambda b, t: (t, b, 0)),   # gx
                pl.BlockSpec((bt, H), lambda b, t: (b, 0)),          # h0
                pl.BlockSpec((bt, H), lambda b, t: (b, 0)),          # c0
                pl.BlockSpec(memory_space=pl.ANY),                   # W_hh (HBM)
            ],
            out_specs=[
                pl.BlockSpec((tt, bt, H), lambda b, t: (t, b, 0)),   # y
                pl.BlockSpec((bt, H), lambda b, t: (b, 0)),          # c_n
            ],
            scratch_shapes=[
                pltpu.VMEM((bt, H), jnp.float32),          # h carry (f32)
                pltpu.VMEM((bt, H), jnp.float32),          # c carry (f32)
                pltpu.VMEM((H, G), w_hh_fused.dtype),      # single-buffered W_hh
            ],
        ),
        compiler_params=pltpu.CompilerParams(
            dimension_semantics=("parallel", "arbitrary"),
            vmem_limit_bytes=_vmem_limit_bytes()),
    )(gx, h0, c0, w_hh_fused)


# ----------------------------------------------------------------------------
# Linear projection: (T*B, H) @ (H, Opad) + b, lane-dense padded output width.
# ----------------------------------------------------------------------------
def _linear_kernel(x_ref, w_ref, b_ref, o_ref):
    o_ref[...] = (jnp.dot(x_ref[...], w_ref[...],
                          preferred_element_type=jnp.float32) + b_ref[...])


def linear(x_2d, w_pad, b_pad, *, row_block=1024, col_block=1024):
    M, H = x_2d.shape
    Opad = w_pad.shape[1]
    rm = _pick_block(M, row_block, align=8)
    rn = _pick_block(Opad, col_block, align=128)
    return pl.pallas_call(
        _linear_kernel,
        out_shape=jax.ShapeDtypeStruct((M, Opad), jnp.float32),
        grid_spec=pltpu.PrefetchScalarGridSpec(
            num_scalar_prefetch=0,
            grid=(M // rm, Opad // rn),
            in_specs=[
                pl.BlockSpec((rm, H), lambda m, n: (m, 0)),
                pl.BlockSpec((H, rn), lambda m, n: (0, n)),
                pl.BlockSpec((1, rn), lambda m, n: (0, n)),
            ],
            out_specs=pl.BlockSpec((rm, rn), lambda m, n: (m, n)),
        ),
        compiler_params=pltpu.CompilerParams(
            dimension_semantics=("parallel", "parallel"),
            vmem_limit_bytes=_vmem_limit_bytes()),
    )(x_2d, w_pad, b_pad)


# ----------------------------------------------------------------------------
# Parameter init (deterministic synthetic; torch layouts + fused kernel layouts)
# ----------------------------------------------------------------------------
def init_params(key, num_classes, hidden, output_dim, num_layers,
                compute_dtype=jnp.float32):
    keys = jax.random.split(key, 3 + 4 * num_layers)
    H, O = hidden, output_dim
    Opad = _round_up(max(O, 1), 128)
    lin_w = jax.random.normal(keys[1], (H, O), jnp.float32) * 0.1   # == W_lin^T
    lin_b = jax.random.normal(keys[2], (1, O), jnp.float32) * 0.1
    params = {
        "embedding": jax.random.normal(keys[0], (num_classes, H),
                                       jnp.float32) * 0.1,
        "linear_w_t": lin_w,                 # reference layout
        "linear_b": lin_b,
        # kernel-facing: zero-padded to a 128-multiple width -> unmasked stores
        "linear_w_pad": jnp.pad(lin_w, ((0, 0), (0, Opad - O))).astype(compute_dtype),
        "linear_b_pad": jnp.pad(lin_b, ((0, 0), (0, Opad - O))),
        "output_dim": O,
        "lstm": [],
    }
    for l in range(num_layers):
        k = keys[3 + 4 * l: 3 + 4 * (l + 1)]
        w_ih = jax.random.normal(k[0], (4 * H, H), jnp.float32) * 0.1  # torch layout
        w_hh = jax.random.normal(k[1], (4 * H, H), jnp.float32) * 0.1
        b_ih = jax.random.normal(k[2], (4 * H,), jnp.float32) * 0.1
        b_hh = jax.random.normal(k[3], (4 * H,), jnp.float32) * 0.1
        # Fused kernel layout: (H, 4H) with gate-contiguous columns [i|f|g|o];
        # x @ W.T == x @ W_fused, PyTorch gate order preserved.
        params["lstm"].append({
            "w_ih_fused": w_ih.T.astype(compute_dtype),
            "w_hh_fused": w_hh.T.astype(compute_dtype),
            "bias_fused": (b_ih + b_hh).reshape(1, 4 * H),   # f32
            # original layouts kept only for the pure-JAX reference
            "w_ih": w_ih, "w_hh": w_hh, "b_ih": b_ih, "b_hh": b_hh,
        })
    return params


# ----------------------------------------------------------------------------
# Forward pass (matches RNNTDecoder.forward with input_lengths=None)
# ----------------------------------------------------------------------------
def rnnt_decoder_forward(params, inputs, hidden_states=None):
    """inputs: (B, T) int32 token ids. Returns (outputs (B,T,O), (h_n, c_n))."""
    B, T = inputs.shape
    H = params["embedding"].shape[1]
    num_layers = len(params["lstm"])
    cdt = params["lstm"][0]["w_hh_fused"].dtype        # compute dtype (f32/bf16)

    # Embedding gather directly time-major: avoids a (B,T,H) HBM transpose.
    x_tm = jnp.take(params["embedding"], inputs.T, axis=0).astype(cdt)  # (T,B,H)
    x_flat = x_tm.reshape(T * B, H)

    if hidden_states is None:
        h0 = jnp.zeros((num_layers, B, H), jnp.float32)
        c0 = jnp.zeros((num_layers, B, H), jnp.float32)
    else:
        h0, c0 = hidden_states
        h0 = h0.astype(jnp.float32)
        c0 = c0.astype(jnp.float32)

    h_n, c_n = [], []
    for l in range(num_layers):
        lp = params["lstm"][l]
        gx = input_projection(x_flat, lp["w_ih_fused"], lp["bias_fused"],
                              out_dtype=cdt)             # (T*B, 4H), read x once
        gx = gx.reshape(T, B, 4 * H)                     # free reshape
        y, cn = lstm_layer(gx, h0[l], c0[l], lp["w_hh_fused"])
        h_n.append(y[T - 1].astype(jnp.float32))         # h_n of this layer
        c_n.append(cn)
        x_flat = y.reshape(T * B, H)
        # inter-layer dropout: training-only -> omitted (eval/inference).
    h_n = jnp.stack(h_n, axis=0)
    c_n = jnp.stack(c_n, axis=0)

    out_pad = linear(x_flat, params["linear_w_pad"], params["linear_b_pad"])
    O = params["output_dim"]
    out_flat = out_pad[:, :O]
    # TODO(synk): fold this (T,B,O)->(B,T,O) transpose into the linear out_spec.
    outputs = jnp.transpose(out_flat.reshape(T, B, O), (1, 0, 2))
    return outputs, (h_n, c_n)


# ----------------------------------------------------------------------------
# Pure-JAX reference (independent path: torch concatenated-gate layout, f32)
# ----------------------------------------------------------------------------
def reference_forward(params, inputs, hidden_states=None):
    B, T = inputs.shape
    H = params["embedding"].shape[1]
    num_layers = len(params["lstm"])
    x = jnp.take(params["embedding"], inputs, axis=0).transpose(1, 0, 2)  # (T,B,H)
    if hidden_states is None:
        h0 = jnp.zeros((num_layers, B, H), jnp.float32)
        c0 = jnp.zeros((num_layers, B, H), jnp.float32)
    else:
        h0, c0 = hidden_states

    def cell(lp, carry, x_t):
        h, c = carry
        g = x_t @ lp["w_ih"].T + h @ lp["w_hh"].T + lp["b_ih"] + lp["b_hh"]
        i = jax.nn.sigmoid(g[:, 0 * H:1 * H])
        f = jax.nn.sigmoid(g[:, 1 * H:2 * H])
        gg = jnp.tanh(g[:, 2 * H:3 * H])
        o = jax.nn.sigmoid(g[:, 3 * H:4 * H])
        c = f * c + i * gg
        h = o * jnp.tanh(c)
        return (h, c), h

    h_n, c_n = [], []
    for l in range(num_layers):
        lp = params["lstm"][l]
        (hf, cf), x = jax.lax.scan(functools.partial(cell, lp), (h0[l], c0[l]), x)
        h_n.append(hf)
        c_n.append(cf)
    out = x @ params["linear_w_t"] + params["linear_b"]
    return out.transpose(1, 0, 2), (jnp.stack(h_n), jnp.stack(c_n))


if __name__ == "__main__":
    num_classes, hidden, output_dim, num_layers = 10, 32, 16, 2
    B, T = 2, 8

    key = jax.random.PRNGKey(0)
    pkey, ikey = jax.random.split(key)
    inputs = jax.random.randint(ikey, (B, T), 0, num_classes, jnp.int32)

    # --- f32 path: strict check against the pure-JAX reference ---------------
    params32 = init_params(pkey, num_classes, hidden, output_dim, num_layers,
                           compute_dtype=jnp.float32)
    out32, (h32, c32) = rnnt_decoder_forward(params32, inputs)
    jax.block_until_ready((out32, h32, c32))

    ref_out, (ref_h, ref_c) = reference_forward(params32, inputs)
    assert out32.shape == (B, T, output_dim)
    assert h32.shape == (num_layers, B, hidden)
    assert c32.shape == (num_layers, B, hidden)
    assert jnp.allclose(out32, ref_out, atol=3e-5)
    assert jnp.allclose(h32, ref_h, atol=3e-5)
    assert jnp.allclose(c32, ref_c, atol=3e-5)

    # --- bf16 weights/gx/y path (MXU bf16, f32 accumulate): loose check ------
    params16 = init_params(pkey, num_classes, hidden, output_dim, num_layers,
                           compute_dtype=jnp.bfloat16)
    out16, (h16, c16) = rnnt_decoder_forward(params16, inputs)
    jax.block_until_ready((out16, h16, c16))
    assert jnp.allclose(out16, ref_out, atol=2e-2)
    assert jnp.allclose(h16, ref_h, atol=2e-2)
    assert jnp.allclose(c16, ref_c, atol=2e-2)

    print("KERNEL_OK")
</pallas_src>

<mosaic_0001>
module attributes {stable_mosaic.version = 11 : i64} {
  func.func @_input_proj_kernel(%arg0: i32, %arg1: memref<16x32xf32, #tpu.memory_space<vmem>>, %arg2: memref<32x128xf32, #tpu.memory_space<vmem>>, %arg3: memref<1x128xf32, #tpu.memory_space<vmem>>, %arg4: memref<16x128xf32, #tpu.memory_space<vmem>>) attributes {dimension_semantics = [#tpu.dimension_semantics<parallel>], iteration_bounds = array<i64: 1>, scalar_prefetch = 0 : i64, scratch_operands = 0 : i64, tpu.core_type = #tpu.core_type<tc>, window_params = [{transform_indices = @transform_0, window_bounds = array<i64: 16, 32>}, {pipeline_mode = #tpu.pipeline_mode<synchronous>, transform_indices = @transform_1, window_bounds = array<i64: 32, 128>}, {pipeline_mode = #tpu.pipeline_mode<synchronous>, transform_indices = @transform_2, window_bounds = array<i64: 1, 128>}, {transform_indices = @transform_3, window_bounds = array<i64: 16, 128>}]} {
    %c0 = arith.constant 0 : index
    %c0_0 = arith.constant 0 : index
    %0 = vector.load %arg1[%c0, %c0_0] : memref<16x32xf32, #tpu.memory_space<vmem>>, vector<16x32xf32>
    %c0_1 = arith.constant 0 : index
    %c0_2 = arith.constant 0 : index
    %1 = vector.load %arg2[%c0_1, %c0_2] : memref<32x128xf32, #tpu.memory_space<vmem>>, vector<32x128xf32>
    %cst = arith.constant dense<0.000000e+00> : vector<16x128xf32>
    %2 = tpu.matmul %0, %1, %cst {dimension_numbers = #tpu.dot_dimension_numbers<[1], [0], [0], [1], [0, 0, 1, 1], [], []>} : vector<16x32xf32>, vector<32x128xf32>, vector<16x128xf32> -> vector<16x128xf32>
    %c0_3 = arith.constant 0 : index
    %c0_4 = arith.constant 0 : index
    %3 = vector.load %arg3[%c0_3, %c0_4] : memref<1x128xf32, #tpu.memory_space<vmem>>, vector<1x128xf32>
    %4 = vector.broadcast %3 : vector<1x128xf32> to vector<16x128xf32>
    %5 = arith.addf %2, %4 : vector<16x128xf32>
    %c0_5 = arith.constant 0 : index
    %c0_6 = arith.constant 0 : index
    %6 = vector.load %arg4[%c0_5, %c0_6] : memref<16x128xf32, #tpu.memory_space<vmem>>, vector<16x128xf32>
    tpu.vector_store %arg4[%c0_5, %c0_6], %5 {strides = array<i32>} : memref<16x128xf32, #tpu.memory_space<vmem>>, vector<16x128xf32>,
    return
  }
  func.func @transform_0(%arg0: i32) -> (i32, i32) {
    %c0_i32 = arith.constant 0 : i32
    %c0_i32_0 = arith.constant 0 : i32
    return %arg0, %c0_i32 : i32, i32
  }
  func.func @transform_1(%arg0: i32) -> (i32, i32) {
    %c0_i32 = arith.constant 0 : i32
    %c0_i32_0 = arith.constant 0 : i32
    %c0_i32_1 = arith.constant 0 : i32
    return %c0_i32, %c0_i32_0 : i32, i32
  }
  func.func @transform_2(%arg0: i32) -> (i32, i32) {
    %c0_i32 = arith.constant 0 : i32
    %c0_i32_0 = arith.constant 0 : i32
    %c0_i32_1 = arith.constant 0 : i32
    return %c0_i32, %c0_i32_0 : i32, i32
  }
  func.func @transform_3(%arg0: i32) -> (i32, i32) {
    %c0_i32 = arith.constant 0 : i32
    %c0_i32_0 = arith.constant 0 : i32
    return %arg0, %c0_i32 : i32, i32
  }
}

</mosaic_0001>

<bundles_post_ra>
// kernel: tpu_custom_call.1
= control target key start
LH: loop header
LB: loop body
LE: loop exit
PB: predicated region body
PF: predicated region fallthrough
CT: control target
= control target key end

     0   :  { %8 = vsyncpa [#allocation3], 0  ;;  %s245_s0 = inlined_call_operand.hbm [shape: f32[16,32], index: 0, kind: input, shape index: {}]   ;;  %s246_s1 = inlined_call_operand.hbm [shape: f32[32,128], index: 1, kind: input, shape index: {}]   ;;  %s247_s2 = inlined_call_operand.vmem [shape: f32[1,128], index: 2, kind: input, shape index: {}]   ;;  %s248_s3 = inlined_call_operand.hbm [shape: f32[16,128], index: 3, kind: output, shape index: {}]  }
   0x1   :  { %9 = vsyncpa [#allocation6], 0 }
   0x2   :  { %10 = vsyncpa [#allocation4], 0  ;;  %s15_s14 = sshll.u32 %s245_s0, 4  ;;  %s199_s15 = smov [#allocation2]   ;;  %s16_s14 = int_to_ptr.hbm [resolvable:$true] %s15_s14 }
   0x3   :  { %s17_s16 = sshll.u32 %s199_s15, 4  ;;  %s28_s19 = sshll.u32 %s246_s1, 4  ;;  %s18_s16 = int_to_ptr.vmem [resolvable:$true] %s17_s16  ;;  %s29_s19 = int_to_ptr.hbm [resolvable:$true] %s28_s19 }
   0x4   :  { %s200_s20 = smov 128   ;;  %s201_s21 = smov 8  }
   0x5   :  { %23 = dma.hbm_to_vmem [thread:$0]  %s16_s14, 256, %s18_s16, [#allocation3], %s200_s20, %s200_s20, %s201_s21  }
   0x6   :  { %s202_s22 = smov [#allocation5]  }
   0x7   :  { %s30_s23 = sshll.u32 %s202_s22, 4  ;;  %s31_s23 = int_to_ptr.vmem [resolvable:$true] %s30_s23 }
   0x8   :  { %36 = dma.hbm_to_vmem [thread:$0]  %s29_s19, 512, %s31_s23, [#allocation6], %s200_s20, %s200_s20, %s201_s21  }
   0x9   :  { %193 = dma.done.wait [#allocation3], 256  }
   0xa   :  { %194 = vsyncadd [#allocation3], 4294967040 }
   0xb   :  { %195 = dma.done.wait [#allocation6], 512  }
   0xc   :  { %196 = vsyncadd [#allocation6], 4294966784  ;;  %v52_v0 = vld [vmem:[#allocation5 + $0x18] sm:$0xff]  ;;  %v51_v1 = vld [vmem:[#allocation5 + $0x10] sm:$0xff]  ;;  %vm57_vm0 = vcmask 261120   ;;  %s203_s24 = smov [#allocation7]  }
   0xd   :  { %76 = vmatpush.msra.mxu0 %v52_v0  ;;  %111 = vmatpush.msra.mxu1 %v52_v0  ;;  %v50_v2 = vld [vmem:[#allocation5 + $0x8] sm:$0xff]  ;;  %v49_v3 = vld [vmem:[#allocation5] sm:$0xff]  ;;  %v47_v4 = vld [vmem:[#allocation2] sm:$0xff]  ;;  %s93_s25 = sshll.u32 %s203_s24, 4  ;;  %s95_s28 = sshll.u32 %s248_s3, 4  ;;  %s94_s25 = int_to_ptr.vmem [resolvable:$true] %s93_s25  ;;  %s96_s28 = int_to_ptr.hbm [resolvable:$true] %s95_s28 }
   0xe   :  { %v48_v5 = vld [vmem:[#allocation2 + $0x8] sm:$0xff]  ;;  %v120_v6 = vld [vmem:[%s247_s2] ss:$0 sm:$0xff] }
   0xf   :  { %77 = vmatpush.msra.mxu0 %v51_v1  ;;  %112 = vmatpush.msra.mxu1 %v51_v1 }
  0x11   :  { %78 = vmatpush.msra.mxu0 %v50_v2  ;;  %113 = vmatpush.msra.mxu1 %v50_v2 }
  0x13   :  { %79 = vmatpush.msra.mxu0 %v49_v3  ;;  %114 = vmatpush.msra.mxu1 %v49_v3 }
  0x14   :  { %109 = vmatmul.msk.f32.vlgmr.msra.gmra.mxu0 %vm57_vm0, %v47_v4  ;;  %110 = vmatmul.msk.f32.vlgmr.msra.gmra.mxu1 %vm57_vm0, %v48_v5 }
  0x91   :  { %v81_v7 = vpop.f32.mrf.mxu0  ;;  %v84_v8 = vpop.f32.mrf.mxu1 }
  0x92   :  { %v82_v9 = vadd.f32 %v120_v6, %v81_v7  ;;  %v85_v10 = vadd.f32 %v120_v6, %v84_v8 }
  0x94   :  { %87 = vst [vmem:[#allocation7] sm:$0xff] %v82_v9 }
  0x95   :  { %88 = vst [vmem:[#allocation7 + $0x8] sm:$0xff] %v85_v10 }
  0x96   :  { %101 = dma.vmem_to_hbm [thread:$0]  %s94_s25, 256, %s96_s28, [#allocation4], %s200_s20, %s200_s20, %s201_s21  }
  0x97   :  { %197 = dma.done.wait [#allocation4], 256  }
  0x98   :  { %198 = vsyncadd [#allocation4], 4294967040 }
  0x99   :  { %106 = vsyncpa [#allocation3], 1 }
  0x9a   :  { %107 = vsyncpa [#allocation6], 1 }
  0x9b   :  { %108 = vsyncpa [#allocation4], 1 }

</bundles_post_ra>
